<compile_context>
chip_gen: v7x
topology: tpu7x:2x2x1
jax: 0.10.0
libtpu: 0.0.40
codegen_flags: <defaults>
</compile_context>

<pallas_src>
import jax
import jax.numpy as jnp
from jax import lax
from jax.experimental import pallas as pl
from jax.experimental.pallas import tpu as pltpu


def mlp_kernel(x_ref, w1_ref, b1_ref, w2_ref, b2_ref, o_ref):
    # x_ref: (TB, D) bf16/f32   w1_ref: (D, H)   b1_ref, w2_ref: (1, H) f32
    # b2_ref: (1,) f32 in SMEM  o_ref: (1, TB) f32 (batch on the lane axis)
    h = jnp.dot(x_ref[...], w1_ref[...], preferred_element_type=jnp.float32)
    h = jnp.maximum(h + b1_ref[...], 0.0)                       # (TB, H) f32, ReLU
    # Second linear (out_features=1): (1, H) x (TB, H)^T -> (1, TB), lane-dense.
    y = lax.dot_general(w2_ref[...], h, (((1,), (1,)), ((), ())),
                        preferred_element_type=jnp.float32)     # (1, TB)
    o_ref[...] = (y + b2_ref[0]).astype(o_ref.dtype)


def linear_regression_forward(x, w1, b1, w2, b2, *, block_b=512, use_bf16=True):
    """x: (B, D); w1: (D, H) pre-transposed; b1: (1, H); w2: (1, H) row; b2: (1,).
    Returns squeezed predictions, matching torch.squeeze(regression(x))."""
    B, D = x.shape
    H = w1.shape[1]

    in_dtype = jnp.bfloat16 if use_bf16 else jnp.float32
    xk = x.astype(in_dtype)
    w1k = w1.astype(in_dtype)
    b1k = jnp.asarray(b1, jnp.float32).reshape(1, H)
    w2k = jnp.asarray(w2, jnp.float32).reshape(1, H)
    b2k = jnp.asarray(b2, jnp.float32).reshape(1)

    # --- batch tiling -----------------------------------------------------
    if B <= block_b:
        tb, b_pad = B, B                       # single full-extent tile
    else:
        tb = block_b                           # lane-aligned tile
        assert tb % 128 == 0, "block_b must be a multiple of 128"
        b_pad = pl.cdiv(B, tb) * tb
        if b_pad != B:
            xk = jnp.pad(xk, ((0, b_pad - B), (0, 0)))
    grid = (b_pad // tb,)

    # --- VMEM budget: double-buffered x/out tiles + resident weights -------
    vmem_est = (2 * tb * D * xk.dtype.itemsize          # x tiles (pipelined)
                + 2 * tb * 4                            # output tiles
                + 2 * (D * H * w1k.dtype.itemsize + 2 * H * 4))
    vmem_limit = int(min(max(4 * vmem_est, 16 * 1024 * 1024), 96 * 1024 * 1024))

    out = pl.pallas_call(
        mlp_kernel,
        out_shape=jax.ShapeDtypeStruct((1, b_pad), jnp.float32),
        grid_spec=pltpu.PrefetchScalarGridSpec(
            num_scalar_prefetch=0,
            grid=grid,
            in_specs=[
                pl.BlockSpec((tb, D), lambda i: (i, 0)),   # x   (pipelined)
                pl.BlockSpec((D, H), lambda i: (0, 0)),    # w1  (resident)
                pl.BlockSpec((1, H), lambda i: (0, 0)),    # b1  (resident)
                pl.BlockSpec((1, H), lambda i: (0, 0)),    # w2 row (resident)
                pl.BlockSpec(memory_space=pltpu.MemorySpace.SMEM),  # b2 scalar
            ],
            out_specs=pl.BlockSpec((1, tb), lambda i: (0, i)),
        ),
        compiler_params=pltpu.CompilerParams(
            dimension_semantics=("parallel",),
            vmem_limit_bytes=vmem_limit),
    )(xk, w1k, b1k, w2k, b2k)

    # (1, b_pad) -> valid batch; torch.squeeze removes all size-1 dims.
    return jnp.squeeze(out[0, :B])


def init_params(key, input_size, hidden_size):
    # PyTorch nn.Linear default init: U(-1/sqrt(fan_in), +1/sqrt(fan_in)).
    k1, k2, k3, k4 = jax.random.split(key, 4)
    bound1 = 1.0 / (input_size ** 0.5)
    bound2 = 1.0 / (hidden_size ** 0.5)
    # Layer-1 weight stored as (in, out); layer-2 weight stored as a (1, H) row.
    w1 = jax.random.uniform(k1, (input_size, hidden_size), jnp.float32, -bound1, bound1)
    b1 = jax.random.uniform(k2, (1, hidden_size), jnp.float32, -bound1, bound1)
    w2 = jax.random.uniform(k3, (1, hidden_size), jnp.float32, -bound2, bound2)
    b2 = jax.random.uniform(k4, (1,), jnp.float32, -bound2, bound2)
    return w1, b1, w2, b2


def _reference(x, w1, b1, w2, b2, use_bf16=True):
    if use_bf16:  # mirror the kernel's bf16 input/weight quantization
        x = x.astype(jnp.bfloat16).astype(jnp.float32)
        w1 = w1.astype(jnp.bfloat16).astype(jnp.float32)
    h = jnp.maximum(jnp.dot(x, w1, precision=lax.Precision.HIGHEST) + b1, 0.0)
    return jnp.squeeze(jnp.sum(h * w2, axis=-1) + b2)


if __name__ == "__main__":
    key = jax.random.PRNGKey(0)
    kx, kp, kx2 = jax.random.split(key, 3)

    # Small shapes consistent with the module (single-tile path).
    batch, input_size, hidden_size = 8, 32, 64
    x = jax.random.normal(kx, (batch, input_size), jnp.float32)
    params = init_params(kp, input_size, hidden_size)

    y = linear_regression_forward(x, *params)
    jax.block_until_ready(y)
    y_ref = _reference(x, *params)
    assert y.shape == (batch,)
    assert jnp.allclose(y, y_ref, atol=1e-2, rtol=1e-2)

    # Larger, non-multiple batch exercising the tiled/pipelined path
    # (grid of 4, padded to 1024, parallel batch axis).
    batch2 = 1000
    x2 = jax.random.normal(kx2, (batch2, input_size), jnp.float32)
    y2 = linear_regression_forward(x2, *params, block_b=256)
    jax.block_until_ready(y2)
    y2_ref = _reference(x2, *params)
    assert y2.shape == (batch2,)
    assert jnp.allclose(y2, y2_ref, atol=1e-2, rtol=1e-2)

    print("KERNEL_OK")
</pallas_src>

<mosaic_0001>
module attributes {stable_mosaic.version = 11 : i64} {
  func.func @mlp_kernel(%arg0: i32, %arg1: memref<8x32xbf16, #tpu.memory_space<vmem>>, %arg2: memref<32x64xbf16, #tpu.memory_space<vmem>>, %arg3: memref<1x64xf32, #tpu.memory_space<vmem>>, %arg4: memref<1x64xf32, #tpu.memory_space<vmem>>, %arg5: memref<1xf32, #tpu.memory_space<smem>>, %arg6: memref<1x8xf32, #tpu.memory_space<vmem>>) attributes {dimension_semantics = [#tpu.dimension_semantics<parallel>], iteration_bounds = array<i64: 1>, scalar_prefetch = 0 : i64, scratch_operands = 0 : i64, tpu.core_type = #tpu.core_type<tc>, window_params = [{transform_indices = @transform_0, window_bounds = array<i64: 8, 32>}, {pipeline_mode = #tpu.pipeline_mode<synchronous>, transform_indices = @transform_1, window_bounds = array<i64: 32, 64>}, {pipeline_mode = #tpu.pipeline_mode<synchronous>, transform_indices = @transform_2, window_bounds = array<i64: 1, 64>}, {pipeline_mode = #tpu.pipeline_mode<synchronous>, transform_indices = @transform_3, window_bounds = array<i64: 1, 64>}, {transform_indices = @transform_4, window_bounds = array<i64: 1>}, {transform_indices = @transform_5, window_bounds = array<i64: 1, 8>}]} {
    %c0 = arith.constant 0 : index
    %c0_0 = arith.constant 0 : index
    %0 = vector.load %arg1[%c0, %c0_0] : memref<8x32xbf16, #tpu.memory_space<vmem>>, vector<8x32xbf16>
    %c0_1 = arith.constant 0 : index
    %c0_2 = arith.constant 0 : index
    %1 = vector.load %arg2[%c0_1, %c0_2] : memref<32x64xbf16, #tpu.memory_space<vmem>>, vector<32x64xbf16>
    %cst = arith.constant dense<0.000000e+00> : vector<8x64xf32>
    %2 = tpu.matmul %0, %1, %cst {dimension_numbers = #tpu.dot_dimension_numbers<[1], [0], [0], [1], [0, 0, 1, 1], [], []>} : vector<8x32xbf16>, vector<32x64xbf16>, vector<8x64xf32> -> vector<8x64xf32>
    %c0_3 = arith.constant 0 : index
    %c0_4 = arith.constant 0 : index
    %3 = vector.load %arg3[%c0_3, %c0_4] : memref<1x64xf32, #tpu.memory_space<vmem>>, vector<1x64xf32>
    %4 = vector.broadcast %3 : vector<1x64xf32> to vector<8x64xf32>
    %5 = arith.addf %2, %4 : vector<8x64xf32>
    %cst_5 = arith.constant 0.000000e+00 : f32
    %6 = vector.broadcast %cst_5 : f32 to vector<8x64xf32>
    %7 = arith.maximumf %5, %6 : vector<8x64xf32>
    %c0_6 = arith.constant 0 : index
    %c0_7 = arith.constant 0 : index
    %8 = vector.load %arg4[%c0_6, %c0_7] : memref<1x64xf32, #tpu.memory_space<vmem>>, vector<1x64xf32>
    %cst_8 = arith.constant dense<0.000000e+00> : vector<1x8xf32>
    %9 = tpu.matmul %8, %7, %cst_8 {dimension_numbers = #tpu.dot_dimension_numbers<[1], [1], [0], [0], [0, 0, 1, 0], [], []>} : vector<1x64xf32>, vector<8x64xf32>, vector<1x8xf32> -> vector<1x8xf32>
    %c0_9 = arith.constant 0 : index
    %10 = memref.load %arg5[%c0_9] : memref<1xf32, #tpu.memory_space<smem>>
    %11 = vector.broadcast %10 : f32 to vector<1x8xf32>
    %12 = arith.addf %9, %11 : vector<1x8xf32>
    %c0_10 = arith.constant 0 : index
    %c0_11 = arith.constant 0 : index
    %13 = vector.load %arg6[%c0_10, %c0_11] : memref<1x8xf32, #tpu.memory_space<vmem>>, vector<1x8xf32>
    tpu.vector_store %arg6[%c0_10, %c0_11], %12 {strides = array<i32>} : memref<1x8xf32, #tpu.memory_space<vmem>>, vector<1x8xf32>,
    return
  }
  func.func @transform_0(%arg0: i32) -> (i32, i32) {
    %c0_i32 = arith.constant 0 : i32
    %c0_i32_0 = arith.constant 0 : i32
    return %arg0, %c0_i32 : i32, i32
  }
  func.func @transform_1(%arg0: i32) -> (i32, i32) {
    %c0_i32 = arith.constant 0 : i32
    %c0_i32_0 = arith.constant 0 : i32
    %c0_i32_1 = arith.constant 0 : i32
    return %c0_i32, %c0_i32_0 : i32, i32
  }
  func.func @transform_2(%arg0: i32) -> (i32, i32) {
    %c0_i32 = arith.constant 0 : i32
    %c0_i32_0 = arith.constant 0 : i32
    %c0_i32_1 = arith.constant 0 : i32
    return %c0_i32, %c0_i32_0 : i32, i32
  }
  func.func @transform_3(%arg0: i32) -> (i32, i32) {
    %c0_i32 = arith.constant 0 : i32
    %c0_i32_0 = arith.constant 0 : i32
    %c0_i32_1 = arith.constant 0 : i32
    return %c0_i32, %c0_i32_0 : i32, i32
  }
  func.func @transform_4(%arg0: i32) -> i32 {
    %c0_i32 = arith.constant 0 : i32
    %c0_i32_0 = arith.constant 0 : i32
    return %c0_i32 : i32
  }
  func.func @transform_5(%arg0: i32) -> (i32, i32) {
    %c0_i32 = arith.constant 0 : i32
    %c0_i32_0 = arith.constant 0 : i32
    return %c0_i32, %arg0 : i32, i32
  }
}

</mosaic_0001>

<bundles_post_ra>
// kernel: tpu_custom_call.1
= control target key start
LH: loop header
LB: loop body
LE: loop exit
PB: predicated region body
PF: predicated region fallthrough
CT: control target
= control target key end

     0   :  { %11 = vsyncpa [#allocation4], 0  ;;  %s410_s0 = inlined_call_operand.hbm [shape: bf16[8,32], index: 0, kind: input, shape index: {}]   ;;  %s411_s1 = inlined_call_operand.hbm [shape: bf16[32,64], index: 1, kind: input, shape index: {}]   ;;  %s412_s2 = inlined_call_operand.vmem [shape: f32[1,64], index: 2, kind: input, shape index: {}]   ;;  %s413_s3 = inlined_call_operand.vmem [shape: f32[1,64], index: 3, kind: input, shape index: {}]   ;;  %s414_s4 = inlined_call_operand.<no memory space> [shape: f32[1], index: 4, kind: input, shape index: {}]   ;;  %s415_s5 = inlined_call_operand.hbm [shape: f32[1,8], index: 5, kind: output, shape index: {}]  }
   0x1   :  { %12 = vsyncpa [#allocation7], 0 }
   0x2   :  { %13 = vsyncpa [#allocation5], 0  ;;  %s321_s18 = smov [#allocation3]   ;;  %s322_s20 = smov [#allocation6]  }
   0x3   :  { %s20_s19 = sshll.u32 %s321_s18, 4  ;;  %s29_s21 = sshll.u32 %s322_s20, 4  ;;  %s21_s19 = int_to_ptr.vmem [resolvable:$true] %s20_s19  ;;  %s358_s21 = int_to_ptr.vmem [resolvable:$true] %s29_s21 }
   0x4   :  { %s249_s24 = scalar_lea.hbm %s410_s0, 64 }
   0x5   :  { %p250_p0 = scmp.ne.s32.totalorder %s410_s0, %s249_s24  ;;  %p253_p1 = scmp.lt.u32.totalorder %s249_s24, %s410_s0 }
   0x7   :  { %p255_p2 = pnand %p253_p1, %p250_p0 }
   0x9   :  { %258 = shalt.err (!%p255_p2)
}
   0xa   :  { %s259_s29 = scalar_lea.vmem %s21_s19, 64  ;;  %p264_p4 = scmp.lt.s32.totalorder %s21_s19, %s21_s19 }
   0xb   :  { %p260_p3 = scmp.ne.s32.totalorder %s21_s19, %s259_s29  ;;  %p265_p5 = scmp.lt.s32.totalorder %s259_s29, %s259_s29 }
   0xd   :  { %p266_p6 = por %p265_p5, %p264_p4 }
   0xf   :  { %p267_p7 = pnand %p266_p6, %p260_p3 }
  0x11   :  { %270 = shalt.err (!%p267_p7)
}
  0x12   :  { %23 = dma.hbm_to_vmem [thread:$0]  %s410_s0, 64, %s21_s19, [#allocation4]  }
  0x13   :  { %s271_s9 = scalar_lea.hbm %s411_s1, 256 }
  0x14   :  { %p272_p8 = scmp.ne.s32.totalorder %s411_s1, %s271_s9  ;;  %p275_p9 = scmp.lt.u32.totalorder %s271_s9, %s411_s1 }
  0x16   :  { %p277_p10 = pnand %p275_p9, %p272_p8 }
  0x18   :  { %280 = shalt.err (!%p277_p10)
}
  0x19   :  { %s281_s14 = scalar_lea.vmem %s358_s21, 256  ;;  %p286_p12 = scmp.lt.s32.totalorder %s358_s21, %s358_s21 }
  0x1a   :  { %p282_p11 = scmp.ne.s32.totalorder %s358_s21, %s281_s14  ;;  %p287_p13 = scmp.lt.s32.totalorder %s281_s14, %s281_s14 }
  0x1c   :  { %p288_p0 = por %p287_p13, %p286_p12 }
  0x1e   :  { %p289_p1 = pnand %p288_p0, %p282_p11 }
  0x20   :  { %292 = shalt.err (!%p289_p1)
}
  0x21   :  { %s323_s0 = smov 64   ;;  %s324_s15 = smov 4  }
  0x22   :  { %35 = dma.hbm_to_vmem [thread:$0]  %s411_s1, 256, %s358_s21, [#allocation7], %s323_s0, %s323_s0, %s324_s15  }
  0x23   :  { %315 = dma.done.wait [#allocation4], 64  }
  0x24   :  { %316 = vsyncadd [#allocation4], 4294967232 }
  0x25   :  { %317 = dma.done.wait [#allocation7], 256  }
  0x26   :  { %318 = vsyncadd [#allocation7], 4294967040  ;;  %v325_v0 = vmov 0.0   ;;  %vm326_vm0 = vmmov 0   ;;  %v247_v1 = vld [vmem:[#allocation6] sm:$0xff]   ;;  %v248_v2 = vld [vmem:[#allocation6 + $0x8] sm:$0xff]   ;;  %v120_v12 = vstv %s414_s4 }
  0x27   :  { %227 = vmatprep.subr.bf16.mxu0 %v325_v0  ;;  %231 = vmatprep.mubr.msk.bf16.mxu0 %vm326_vm0, %v325_v0  ;;  %v49_v3 = vld [vmem:[#allocation3] sm:$0xf]  ;;  %vm73_vm1 = vcmask 261120   ;;  %vm121_vm2 = vcmask 523264   ;;  %s327_s23 = smov [#allocation8]   ;;  %vm198_vm3 = vcmask 57344  }
  0x28   :  { %235 = vmatprep.subr.mxu1 %v325_v0  ;;  %237 = vmatprep.mubr.msk.f32.mxu1 %vm326_vm0, %v325_v0  ;;  %v216_v4 = vld [vmem:[%s412_s2] ss:$0 sm:$0xff]  ;;  %s206_s24 = sshll.u32 %s327_s23, 4  ;;  %s207_s24 = int_to_ptr.vmem [resolvable:$true] %s206_s24 }
  0x29   :  { %228 = vmatpush3.bf16.msra.mxu0 %v247_v1  ;;  %v118_v11 = vld [vmem:[%s413_s3] sm:$0x1]  ;;  %s293_s2 = scalar_lea.vmem %s207_s24, 16  ;;  %s297_s25 = scalar_lea.vmem %s207_s24, 32 }
  0x2a   :  { %229 = vmatprep.subr.bf16.mxu0 %v325_v0  ;;  %p294_p2 = scmp.ne.s32.totalorder %s207_s24, %s293_s2  ;;  %p298_p3 = scmp.lt.s32.totalorder %s207_s24, %s207_s24 }
  0x2b   :  { %p299_p4 = scmp.lt.s32.totalorder %s297_s25, %s293_s2 }
  0x2d   :  { %230 = vmatpush3.bf16.msra.mxu0 %v248_v2  ;;  %p300_p5 = por %p299_p4, %p298_p3 }
  0x2f   :  { %p301_p6 = pnand %p300_p5, %p294_p2 }
  0x30   :  { %232 = vmatmul.mubr.msk.bf16.vlgmr.msra.gmra.mrb[0].mxu0 %vm73_vm1, %v49_v3 }
 0x103   :  { %v111_v5 = vpop.f32.mrb[0].mxu0 }
 0x104   :  { %v112_v6 = vadd.f32 %v216_v4, %v111_v5  ;;  %v233_v7 = vpop.f32.mrb[1].mxu0 }
 0x105   :  { %v114_v8 = vpop.f32.mrb[2].mxu0 }
 0x106   :  { %v117_v9 = vmax.f32 %v112_v6, 0.0  ;;  %v234_v10 = vpop.f32.mrb[3].mxu0 }
 0x108   :  { %236 = vmatpush3.xpose.msk.msra.mxu1 %vm121_vm2, %v117_v9 }
 0x10b   :  { %238 = vmatmul.mubr.msk.f32.vlgmr.msra.gmra.mrb[0].mxu1 %vm121_vm2, %v118_v11 }
 0x1de   :  { %v194_v13 = vpop.f32.mrb[0].mxu1 }
 0x1df   :  { %v195_v14 = vadd.f32 %v194_v13, %v120_v12  ;;  %v239_v15 = vpop.f32.mrb[1].mxu1 }
 0x1e1   :  { %199 = vst.msk [vmem:[#allocation8] sm:$0x1] %vm198_vm3, %v195_v14 }
 0x1e2   :  { %304 = shalt.err (!%p301_p6)
}
 0x1e3   :  { %s305_s4 = scalar_lea.hbm %s415_s5, 16 }
 0x1e4   :  { %p306_p7 = scmp.ne.s32.totalorder %s415_s5, %s305_s4  ;;  %p309_p8 = scmp.lt.u32.totalorder %s305_s4, %s415_s5 }
 0x1e6   :  { %p311_p9 = pnand %p309_p8, %p306_p7 }
 0x1e8   :  { %314 = shalt.err (!%p311_p9)
}
 0x1e9   :  { %209 = dma.vmem_to_hbm [thread:$0]  %s207_s24, 16, %s415_s5, [#allocation5]  }
 0x1ea   :  { %319 = dma.done.wait [#allocation5], 16  }
 0x1eb   :  { %320 = vsyncadd [#allocation5], 4294967280 }
 0x1ec   :  { %213 = vsyncpa [#allocation4], 1 }
 0x1ed   :  { %214 = vsyncpa [#allocation7], 1 }
 0x1ee   :  { %215 = vsyncpa [#allocation5], 1 }

</bundles_post_ra>
